<compile_context>
chip_gen: v7x
topology: tpu7x:2x2x1
jax: 0.10.0
libtpu: 0.0.40
codegen_flags: <defaults>
</compile_context>

<pallas_src>
import functools

import jax
import jax.numpy as jnp
from jax import lax
from jax.experimental import pallas as pl
from jax.experimental.pallas import tpu as pltpu

EPS = 1e-10


def _to_i32(x):
    x &= 0xFFFFFFFF
    return x - (1 << 32) if x >= (1 << 31) else x


_MIX_A = _to_i32(0x9E3779B9)   # golden-ratio constant
_MIX_B = _to_i32(0x7FEB352D)   # splitmix32 finalizer constants
_MIX_C = _to_i32(0x846CA68B)


def _shr(x, k):
    # logical right shift on int32 lanes (lax op requires matching shapes/dtypes)
    return lax.shift_right_logical(x, jnp.full(x.shape, k, x.dtype))


def _mix32(x):
    """splitmix32-style integer finalizer; wrapping int32 arithmetic (VPU-only)."""
    x = x ^ _shr(x, 16)
    x = x * jnp.int32(_MIX_B)
    x = x ^ _shr(x, 15)
    x = x * jnp.int32(_MIX_C)
    x = x ^ _shr(x, 16)
    return x


def _vq_apc_kernel(seed_ref, x_ref, w1_ref, b1_ref, wcb_ref,
                   codes_ref, logits_ref, *, testing):
    # seed_ref:   (1,)     int32, SMEM (scalar prefetch)
    # x_ref:      (TN, I)  input dtype (f32) row tile; cast to bf16 here
    # w1_ref:     (I, C)   bf16   vq_logits weight, transposed (VMEM-resident)
    # b1_ref:     (1, C)   f32    vq_logits bias
    # wcb_ref:    (C, E)   bf16   codebook weight, transposed (VMEM-resident)
    # codes_ref:  (TN, E)  f32    output codes tile
    # logits_ref: (TN, C)  f32/bf16 output logits tile

    x = x_ref[...].astype(jnp.bfloat16)        # in-kernel cast (free under mem-bound)
    logits = jnp.dot(x, w1_ref[...], preferred_element_type=jnp.float32) + b1_ref[...]
    logits_ref[...] = logits.astype(logits_ref.dtype)

    if testing:
        y = logits
    else:
        # Counter-based Gumbel noise: u ~ U[0,1) from a hashed global element index,
        # g = -log(-log(u + eps) + eps).  Hard gumbel-softmax forward value is
        # one_hot(argmax((logits + g)/tau)) == one_hot(argmax(logits + g)) for tau > 0.
        tn, C = logits.shape
        row0 = pl.program_id(0) * tn
        rows = lax.broadcasted_iota(jnp.int32, (tn, C), 0) + row0
        cols = lax.broadcasted_iota(jnp.int32, (tn, C), 1)
        ctr = rows * C + cols                                  # global flat counter
        h = _mix32(ctr ^ (seed_ref[0] * jnp.int32(_MIX_A)))
        h = _mix32(h + jnp.int32(_MIX_A))
        u = _shr(h, 8).astype(jnp.float32) * jnp.float32(1.0 / (1 << 24))  # [0, 1)
        g = -jnp.log(-jnp.log(u + EPS) + EPS)
        y = logits + g

    # argmax with torch-style first-max tie-breaking, done in f32.
    C = y.shape[-1]
    iota = lax.broadcasted_iota(jnp.int32, y.shape, 1)
    row_max = jnp.max(y, axis=-1, keepdims=True)
    idx = jnp.min(jnp.where(y >= row_max, iota, C), axis=-1, keepdims=True)
    onehot = (iota == idx).astype(wcb_ref.dtype)               # bf16 one-hot

    codes_ref[...] = jnp.dot(onehot, wcb_ref[...],
                             preferred_element_type=jnp.float32
                             ).astype(codes_ref.dtype)


def _pick_tile(n, row_tile):
    """Pick a row tile that divides n whenever possible (so no output padding/slicing)."""
    if n <= row_tile:
        return n, n                       # single full block (full-dim exempt from 8-div)
    if n % row_tile == 0:
        return row_tile, n
    for tn in range(row_tile, 255, -16):  # multiples of 16 (bf16 packs 16 sublanes/vreg)
        if n % tn == 0:
            return tn, n
    n_pad = ((n + row_tile - 1) // row_tile) * row_tile
    return row_tile, n_pad                # ragged fallback: pad + slice


@functools.partial(jax.jit, static_argnames=("testing", "row_tile", "logits_dtype"))
def vq_apc_forward(inputs_BxLxI, w_logits_CxI, b_logits_C, w_codebook_ExC,
                   seed, gumbel_temperature, testing=False, row_tile=2048,
                   logits_dtype=jnp.float32):
    """Pallas forward of VqApcLayer. Returns (codes_BxLxE, logits_BxLxC)."""
    # tau only scales the soft probabilities; the hard forward value (argmax) is
    # invariant to tau > 0, so it is not needed in the kernel.
    del gumbel_temperature

    B, L, I = inputs_BxLxI.shape
    C = w_logits_CxI.shape[0]
    E = w_codebook_ExC.shape[0]
    N = B * L
    TN, N_pad = _pick_tile(N, int(row_tile))   # keep row_tile <= 2048 on v7x (64 MiB VMEM)

    x = inputs_BxLxI.reshape(N, I)             # free under jit; bf16 cast is in-kernel
    if N_pad != N:
        x = jnp.pad(x, ((0, N_pad - N), (0, 0)))
    w1 = w_logits_CxI.T.astype(jnp.bfloat16)                 # (I, C)  tiny, one-time
    b1 = b_logits_C.reshape(1, C).astype(jnp.float32)        # (1, C)
    wcb = w_codebook_ExC.T.astype(jnp.bfloat16)              # (C, E)
    seed_arr = jnp.reshape(jnp.asarray(seed, jnp.int32), (1,))

    kernel = functools.partial(_vq_apc_kernel, testing=bool(testing))
    n_tiles = N_pad // TN

    grid_spec = pltpu.PrefetchScalarGridSpec(
        num_scalar_prefetch=1,                                # seed -> SMEM
        grid=(n_tiles,),
        in_specs=[
            pl.BlockSpec((TN, I), lambda i, seed: (i, 0)),    # x row tile
            pl.BlockSpec((I, C), lambda i, seed: (0, 0)),     # W1 (VMEM-resident)
            pl.BlockSpec((1, C), lambda i, seed: (0, 0)),     # b1 (VMEM-resident)
            pl.BlockSpec((C, E), lambda i, seed: (0, 0)),     # Wcb (VMEM-resident)
        ],
        out_specs=[
            pl.BlockSpec((TN, E), lambda i, seed: (i, 0)),    # codes row tile
            pl.BlockSpec((TN, C), lambda i, seed: (i, 0)),    # logits row tile
        ],
    )

    logits_bytes = jnp.dtype(logits_dtype).itemsize
    x_bytes = jnp.dtype(x.dtype).itemsize
    cost = pl.CostEstimate(
        flops=2 * N_pad * I * C + 2 * N_pad * C * E,
        transcendentals=0 if testing else 2 * N_pad * C,
        bytes_accessed=(N_pad * I * x_bytes + N_pad * C * logits_bytes + N_pad * E * 4
                        + I * C * 2 + C * E * 2 + C * 4),
    )

    # Rough VMEM footprint: double-buffered x + outputs, plus resident weights (x2 buffers).
    vmem_est = (2 * TN * I * x_bytes
                + 2 * TN * (C * logits_bytes + E * 4)
                + 2 * (I * C * 2 + C * E * 2 + C * 4))
    cp_kwargs = dict(dimension_semantics=("parallel",))       # megacore sharding on v7x
    if vmem_est > 32 * 1024 * 1024:
        cp_kwargs["vmem_limit_bytes"] = min(int(vmem_est * 5 // 4), 128 * 1024 * 1024)

    codes, logits = pl.pallas_call(
        kernel,
        grid_spec=grid_spec,
        out_shape=[
            jax.ShapeDtypeStruct((N_pad, E), jnp.float32),
            jax.ShapeDtypeStruct((N_pad, C), logits_dtype),
        ],
        compiler_params=pltpu.CompilerParams(**cp_kwargs),
        cost_estimate=cost,
    )(seed_arr, x, w1, b1, wcb)

    if N_pad != N:
        codes = codes[:N]
        logits = logits[:N]
    return codes.reshape(B, L, E), logits.reshape(B, L, C)


if __name__ == "__main__":
    # Small module hyperparameters consistent with the forward signature.
    B, L = 2, 8
    input_size = 32
    codebook_size = 64
    code_dim = 32
    gumbel_temperature = 0.5

    key = jax.random.PRNGKey(0)
    k_x, k_w1, k_b1, k_wcb = jax.random.split(key, 4)

    inputs_BxLxI = jax.random.normal(k_x, (B, L, input_size), dtype=jnp.float32)
    w_logits_CxI = jax.random.normal(k_w1, (codebook_size, input_size),
                                     dtype=jnp.float32) * 0.1
    b_logits_C = jax.random.normal(k_b1, (codebook_size,), dtype=jnp.float32) * 0.1
    w_codebook_ExC = jax.random.normal(k_wcb, (code_dim, codebook_size),
                                       dtype=jnp.float32) * 0.1

    # Training mode (Gumbel noise generated in-kernel, counter-hash PRNG).
    codes_tr, logits_tr = vq_apc_forward(inputs_BxLxI, w_logits_CxI, b_logits_C,
                                         w_codebook_ExC, seed=1234,
                                         gumbel_temperature=gumbel_temperature,
                                         testing=False)
    # Eval mode (pure argmax of logits, no noise work compiled in).
    codes_te, logits_te = vq_apc_forward(inputs_BxLxI, w_logits_CxI, b_logits_C,
                                         w_codebook_ExC, seed=0,
                                         gumbel_temperature=gumbel_temperature,
                                         testing=True)
    jax.block_until_ready((codes_tr, logits_tr, codes_te, logits_te))

    # ---- correctness checks ----
    assert codes_tr.shape == (B, L, code_dim)
    assert logits_tr.shape == (B, L, codebook_size)
    assert codes_te.shape == (B, L, code_dim)
    assert logits_te.shape == (B, L, codebook_size)

    # Logits vs reference computed on the bf16-rounded operands the kernel sees.
    x_bf = inputs_BxLxI.astype(jnp.bfloat16).astype(jnp.float32)
    w_bf = w_logits_CxI.astype(jnp.bfloat16).astype(jnp.float32)
    ref_logits = jnp.einsum("bli,ci->blc", x_bf, w_bf) + b_logits_C
    assert jnp.allclose(logits_tr, ref_logits, atol=2e-3)
    assert jnp.allclose(logits_te, ref_logits, atol=2e-3)
    # Also loosely vs the pure-f32 reference.
    ref_logits_f32 = jnp.einsum("bli,ci->blc", inputs_BxLxI, w_logits_CxI) + b_logits_C
    assert jnp.allclose(logits_te, ref_logits_f32, atol=5e-2)

    # Codebook rows as the kernel sees them (bf16-rounded codebook weights).
    cb_rows = w_codebook_ExC.astype(jnp.bfloat16).astype(jnp.float32).T  # (C, E)

    # Eval mode: codes must be exactly the codebook row picked by argmax of the
    # kernel's own (returned) logits.
    idx_te = jnp.argmax(logits_te, axis=-1)                   # (B, L)
    assert jnp.allclose(codes_te, cb_rows[idx_te], atol=1e-5)

    # Training mode: noise is sampled in-kernel (no bitwise reference), but every
    # output row must still be exactly one codebook row.
    flat = codes_tr.reshape(-1, code_dim)
    row_err = jnp.min(jnp.max(jnp.abs(flat[:, None, :] - cb_rows[None, :, :]),
                              axis=-1), axis=-1)
    assert float(jnp.max(row_err)) < 1e-5

    print("KERNEL_OK")
</pallas_src>

<mosaic_0001>
module attributes {stable_mosaic.version = 11 : i64} {
  func.func @_vq_apc_kernel(%arg0: i32, %arg1: memref<1xi32, #tpu.memory_space<smem>>, %arg2: memref<16x32xf32, #tpu.memory_space<vmem>>, %arg3: memref<32x64xbf16, #tpu.memory_space<vmem>>, %arg4: memref<1x64xf32, #tpu.memory_space<vmem>>, %arg5: memref<64x32xbf16, #tpu.memory_space<vmem>>, %arg6: memref<16x32xf32, #tpu.memory_space<vmem>>, %arg7: memref<16x64xf32, #tpu.memory_space<vmem>>) attributes {dimension_semantics = [#tpu.dimension_semantics<parallel>], iteration_bounds = array<i64: 1>, scalar_prefetch = 1 : i64, scratch_operands = 0 : i64, tpu.core_type = #tpu.core_type<tc>, window_params = [{transform_indices = @transform_0, window_bounds = array<i64: 16, 32>}, {pipeline_mode = #tpu.pipeline_mode<synchronous>, transform_indices = @transform_1, window_bounds = array<i64: 32, 64>}, {pipeline_mode = #tpu.pipeline_mode<synchronous>, transform_indices = @transform_2, window_bounds = array<i64: 1, 64>}, {pipeline_mode = #tpu.pipeline_mode<synchronous>, transform_indices = @transform_3, window_bounds = array<i64: 64, 32>}, {transform_indices = @transform_4, window_bounds = array<i64: 16, 32>}, {transform_indices = @transform_5, window_bounds = array<i64: 16, 64>}]} {
    %c0 = arith.constant 0 : index
    %c0_0 = arith.constant 0 : index
    %0 = vector.load %arg2[%c0, %c0_0] : memref<16x32xf32, #tpu.memory_space<vmem>>, vector<16x32xf32>
    %1 = arith.truncf %0 : vector<16x32xf32> to vector<16x32xbf16>
    %c0_1 = arith.constant 0 : index
    %c0_2 = arith.constant 0 : index
    %2 = vector.load %arg3[%c0_1, %c0_2] : memref<32x64xbf16, #tpu.memory_space<vmem>>, vector<32x64xbf16>
    %cst = arith.constant dense<0.000000e+00> : vector<16x64xf32>
    %3 = tpu.matmul %1, %2, %cst {dimension_numbers = #tpu.dot_dimension_numbers<[1], [0], [0], [1], [0, 0, 1, 1], [], []>} : vector<16x32xbf16>, vector<32x64xbf16>, vector<16x64xf32> -> vector<16x64xf32>
    %c0_3 = arith.constant 0 : index
    %c0_4 = arith.constant 0 : index
    %4 = vector.load %arg4[%c0_3, %c0_4] : memref<1x64xf32, #tpu.memory_space<vmem>>, vector<1x64xf32>
    %5 = vector.broadcast %4 : vector<1x64xf32> to vector<16x64xf32>
    %6 = arith.addf %3, %5 : vector<16x64xf32>
    %c0_5 = arith.constant 0 : index
    %c0_6 = arith.constant 0 : index
    %7 = vector.load %arg7[%c0_5, %c0_6] : memref<16x64xf32, #tpu.memory_space<vmem>>, vector<16x64xf32>
    tpu.vector_store %arg7[%c0_5, %c0_6], %6 {strides = array<i32>} : memref<16x64xf32, #tpu.memory_space<vmem>>, vector<16x64xf32>,
    %c16_i32 = arith.constant 16 : i32
    %8 = arith.muli %arg0, %c16_i32 : i32
    %9 = tpu.iota {dimensions = array<i32: 0>} : vector<16x64xi32>
    %10 = vector.broadcast %8 : i32 to vector<16x64xi32>
    %11 = arith.addi %9, %10 : vector<16x64xi32>
    %12 = tpu.iota {dimensions = array<i32: 1>} : vector<16x64xi32>
    %c64_i32 = arith.constant 64 : i32
    %13 = vector.broadcast %c64_i32 : i32 to vector<16x64xi32>
    %14 = arith.muli %11, %13 : vector<16x64xi32>
    %15 = arith.addi %14, %12 : vector<16x64xi32>
    %c0_7 = arith.constant 0 : index
    %16 = memref.load %arg1[%c0_7] : memref<1xi32, #tpu.memory_space<smem>>
    %c-1640531527_i32 = arith.constant -1640531527 : i32
    %17 = arith.muli %16, %c-1640531527_i32 : i32
    %18 = vector.broadcast %17 : i32 to vector<16x64xi32>
    %19 = arith.xori %15, %18 : vector<16x64xi32>
    %c16_i32_8 = arith.constant 16 : i32
    %20 = vector.broadcast %c16_i32_8 : i32 to vector<16x64xi32>
    %21 = arith.shrui %19, %20 : vector<16x64xi32>
    %22 = arith.xori %19, %21 : vector<16x64xi32>
    %c2146121005_i32 = arith.constant 2146121005 : i32
    %23 = vector.broadcast %c2146121005_i32 : i32 to vector<16x64xi32>
    %24 = arith.muli %22, %23 : vector<16x64xi32>
    %c15_i32 = arith.constant 15 : i32
    %25 = vector.broadcast %c15_i32 : i32 to vector<16x64xi32>
    %26 = arith.shrui %24, %25 : vector<16x64xi32>
    %27 = arith.xori %24, %26 : vector<16x64xi32>
    %c-2073254261_i32 = arith.constant -2073254261 : i32
    %28 = vector.broadcast %c-2073254261_i32 : i32 to vector<16x64xi32>
    %29 = arith.muli %27, %28 : vector<16x64xi32>
    %c16_i32_9 = arith.constant 16 : i32
    %30 = vector.broadcast %c16_i32_9 : i32 to vector<16x64xi32>
    %31 = arith.shrui %29, %30 : vector<16x64xi32>
    %32 = arith.xori %29, %31 : vector<16x64xi32>
    %c-1640531527_i32_10 = arith.constant -1640531527 : i32
    %33 = vector.broadcast %c-1640531527_i32_10 : i32 to vector<16x64xi32>
    %34 = arith.addi %32, %33 : vector<16x64xi32>
    %c16_i32_11 = arith.constant 16 : i32
    %35 = vector.broadcast %c16_i32_11 : i32 to vector<16x64xi32>
    %36 = arith.shrui %34, %35 : vector<16x64xi32>
    %37 = arith.xori %34, %36 : vector<16x64xi32>
    %c2146121005_i32_12 = arith.constant 2146121005 : i32
    %38 = vector.broadcast %c2146121005_i32_12 : i32 to vector<16x64xi32>
    %39 = arith.muli %37, %38 : vector<16x64xi32>
    %c15_i32_13 = arith.constant 15 : i32
    %40 = vector.broadcast %c15_i32_13 : i32 to vector<16x64xi32>
    %41 = arith.shrui %39, %40 : vector<16x64xi32>
    %42 = arith.xori %39, %41 : vector<16x64xi32>
    %c-2073254261_i32_14 = arith.constant -2073254261 : i32
    %43 = vector.broadcast %c-2073254261_i32_14 : i32 to vector<16x64xi32>
    %44 = arith.muli %42, %43 : vector<16x64xi32>
    %c16_i32_15 = arith.constant 16 : i32
    %45 = vector.broadcast %c16_i32_15 : i32 to vector<16x64xi32>
    %46 = arith.shrui %44, %45 : vector<16x64xi32>
    %47 = arith.xori %44, %46 : vector<16x64xi32>
    %c8_i32 = arith.constant 8 : i32
    %48 = vector.broadcast %c8_i32 : i32 to vector<16x64xi32>
    %49 = arith.shrui %47, %48 : vector<16x64xi32>
    %50 = arith.sitofp %49 : vector<16x64xi32> to vector<16x64xf32>
    %cst_16 = arith.constant 5.96046448E-8 : f32
    %51 = vector.broadcast %cst_16 : f32 to vector<16x64xf32>
    %52 = arith.mulf %50, %51 : vector<16x64xf32>
    %cst_17 = arith.constant 1.000000e-10 : f32
    %53 = vector.broadcast %cst_17 : f32 to vector<16x64xf32>
    %54 = arith.addf %52, %53 : vector<16x64xf32>
    %55 = math.log %54 : vector<16x64xf32>
    %cst_18 = arith.constant 0.000000e+00 : f32
    %56 = vector.broadcast %cst_18 : f32 to vector<16x64xf32>
    %57 = arith.subf %56, %55 : vector<16x64xf32>
    %cst_19 = arith.constant 1.000000e-10 : f32
    %58 = vector.broadcast %cst_19 : f32 to vector<16x64xf32>
    %59 = arith.addf %57, %58 : vector<16x64xf32>
    %60 = math.log %59 : vector<16x64xf32>
    %cst_20 = arith.constant 0.000000e+00 : f32
    %61 = vector.broadcast %cst_20 : f32 to vector<16x64xf32>
    %62 = arith.subf %61, %60 : vector<16x64xf32>
    %63 = arith.addf %6, %62 : vector<16x64xf32>
    %64 = tpu.iota {dimensions = array<i32: 1>} : vector<16x64xi32>
    %cst_21 = arith.constant dense<0xFF800000> : vector<16xf32>
    %65 = vector.multi_reduction <maximumf>, %63, %cst_21 [1] : vector<16x64xf32> to vector<16xf32>
    %66 = vector.shape_cast %65 : vector<16xf32> to vector<16x1xf32>
    %67 = vector.broadcast %66 : vector<16x1xf32> to vector<16x64xf32>
    %68 = arith.cmpf oge, %63, %67 : vector<16x64xf32>
    %c64_i32_22 = arith.constant 64 : i32
    %69 = vector.broadcast %c64_i32_22 : i32 to vector<16x64xi32>
    %70 = arith.select %68, %64, %69 : vector<16x64xi1>, vector<16x64xi32>
    %cst_23 = arith.constant dense<2147483647> : vector<16xi32>
    %71 = vector.multi_reduction <minsi>, %70, %cst_23 [1] : vector<16x64xi32> to vector<16xi32>
    %72 = vector.shape_cast %71 : vector<16xi32> to vector<16x1xi32>
    %73 = vector.broadcast %72 : vector<16x1xi32> to vector<16x64xi32>
    %74 = arith.cmpi eq, %64, %73 : vector<16x64xi32>
    %75 = arith.extui %74 : vector<16x64xi1> to vector<16x64xi32>
    %76 = arith.sitofp %75 : vector<16x64xi32> to vector<16x64xf32>
    %77 = arith.truncf %76 : vector<16x64xf32> to vector<16x64xbf16>
    %c0_24 = arith.constant 0 : index
    %c0_25 = arith.constant 0 : index
    %78 = vector.load %arg5[%c0_24, %c0_25] : memref<64x32xbf16, #tpu.memory_space<vmem>>, vector<64x32xbf16>
    %cst_26 = arith.constant dense<0.000000e+00> : vector<16x32xf32>
    %79 = tpu.matmul %77, %78, %cst_26 {dimension_numbers = #tpu.dot_dimension_numbers<[1], [0], [0], [1], [0, 0, 1, 1], [], []>} : vector<16x64xbf16>, vector<64x32xbf16>, vector<16x32xf32> -> vector<16x32xf32>
    %c0_27 = arith.constant 0 : index
    %c0_28 = arith.constant 0 : index
    %80 = vector.load %arg6[%c0_27, %c0_28] : memref<16x32xf32, #tpu.memory_space<vmem>>, vector<16x32xf32>
    tpu.vector_store %arg6[%c0_27, %c0_28], %79 {strides = array<i32>} : memref<16x32xf32, #tpu.memory_space<vmem>>, vector<16x32xf32>,
    return
  }
  func.func @transform_0(%arg0: i32, %arg1: memref<1xi32, #tpu.memory_space<smem>>) -> (i32, i32) {
    %c0_i32 = arith.constant 0 : i32
    %c0_i32_0 = arith.constant 0 : i32
    return %arg0, %c0_i32 : i32, i32
  }
  func.func @transform_1(%arg0: i32, %arg1: memref<1xi32, #tpu.memory_space<smem>>) -> (i32, i32) {
    %c0_i32 = arith.constant 0 : i32
    %c0_i32_0 = arith.constant 0 : i32
    %c0_i32_1 = arith.constant 0 : i32
    return %c0_i32, %c0_i32_0 : i32, i32
  }
  func.func @transform_2(%arg0: i32, %arg1: memref<1xi32, #tpu.memory_space<smem>>) -> (i32, i32) {
    %c0_i32 = arith.constant 0 : i32
    %c0_i32_0 = arith.constant 0 : i32
    %c0_i32_1 = arith.constant 0 : i32
    return %c0_i32, %c0_i32_0 : i32, i32
  }
  func.func @transform_3(%arg0: i32, %arg1: memref<1xi32, #tpu.memory_space<smem>>) -> (i32, i32) {
    %c0_i32 = arith.constant 0 : i32
    %c0_i32_0 = arith.constant 0 : i32
    %c0_i32_1 = arith.constant 0 : i32
    return %c0_i32, %c0_i32_0 : i32, i32
  }
  func.func @transform_4(%arg0: i32, %arg1: memref<1xi32, #tpu.memory_space<smem>>) -> (i32, i32) {
    %c0_i32 = arith.constant 0 : i32
    %c0_i32_0 = arith.constant 0 : i32
    return %arg0, %c0_i32 : i32, i32
  }
  func.func @transform_5(%arg0: i32, %arg1: memref<1xi32, #tpu.memory_space<smem>>) -> (i32, i32) {
    %c0_i32 = arith.constant 0 : i32
    %c0_i32_0 = arith.constant 0 : i32
    return %arg0, %c0_i32 : i32, i32
  }
}

</mosaic_0001>

<bundles_post_ra>
// kernel: vq_apc_forward.1
= control target key start
LH: loop header
LB: loop body
LE: loop exit
PB: predicated region body
PF: predicated region fallthrough
CT: control target
= control target key end

     0   :  { %13 = vsyncpa [#allocation5], 0  ;;  %v438_v1 = vmov 0.0   ;;  %vm439_vm0 = vmmov 0   ;;  %s561_s0 = inlined_call_operand.<no memory space> [shape: s32[1], index: 0, kind: input, shape index: {}]   ;;  %s562_s1 = inlined_call_operand.vmem [shape: f32[16,32], index: 1, kind: input, shape index: {}]   ;;  %s563_s2 = inlined_call_operand.vmem [shape: bf16[32,64], index: 2, kind: input, shape index: {}]   ;;  %s564_s3 = inlined_call_operand.vmem [shape: f32[1,64], index: 3, kind: input, shape index: {}]   ;;  %s565_s4 = inlined_call_operand.vmem [shape: bf16[64,32], index: 4, kind: input, shape index: {}]   ;;  %s566_s5 = inlined_call_operand.hbm [shape: f32[16,32], index: 5, kind: output, shape index: {0}]   ;;  %s567_s6 = inlined_call_operand.hbm [shape: f32[16,64], index: 6, kind: output, shape index: {1}]  }
   0x1   :  { %v376_v0 = vld [vmem:[%s563_s2] sm:$0xff]   ;;  %350 = vmatprep.subr.bf16.mxu0 %v438_v1  ;;  %358 = vmatprep.subr.bf16.mxu1 %v438_v1  ;;  %v377_v2 = vld [vmem:[%s563_s2 + $0x8] sm:$0xff]  }
   0x2   :  { %351 = vmatpush3.bf16.msra.mxu0 %v376_v0  ;;  %354 = vmatprep.mubr.msk.bf16.mxu0 %vm439_vm0, %v438_v1  ;;  %v24_v3 = vld [vmem:[%s562_s1] sm:$0xff]  ;;  %v25_v4 = vld [vmem:[%s562_s1 + $0x8] sm:$0xff] }
   0x3   :  { %352 = vmatprep.subr.bf16.mxu0 %v438_v1  ;;  %366 = vmatprep.mubr.msk.bf16.mxu1 %vm439_vm0, %v438_v1  ;;  %v26_v5 = vpack.c.bf16 %v25_v4, %v24_v3 }
   0x4   :  { %14 = vsyncpa [#allocation7], 0  ;;  %vm50_vm1 = vcmask 261120   ;;  %v99_v6 = vlaneseq  ;;  %s112_s1 = smul.u32 2654435769, %s561_s0  ;;  %vm95_vm2 = vcmask 523264  }
   0x6   :  { %353 = vmatpush3.bf16.msra.mxu0 %v377_v2  ;;  %v100_v7 = vshrl.u32 %v99_v6, 7  ;;  %v497_v9 = vand.u32 127, %v99_v6  ;;  %v113_v13 = vstv %s112_s1 }
   0x8   :  { %v101_v8 = vadd.s32 8, %v100_v7  ;;  %v107_v10 = vmul.u32 64, %v100_v7 }
   0x9   :  { %355 = vmatmul.mubr.msk.bf16.vlgmr.msra.gmra.mrb[0].mxu0 %vm50_vm1, %v26_v5 }
   0xa   :  { %v108_v11 = vmul.u32 64, %v101_v8  ;;  %v109_v12 = vadd.s32 %v107_v10, %v497_v9  ;;  %v331_v8 = vld [vmem:[%s564_s3] ss:$0 sm:$0xff] }
   0xc   :  { %v110_v14 = vadd.s32 %v108_v11, %v497_v9  ;;  %v114_v15 = vxor.u32 %v113_v13, %v109_v12 }
   0xe   :  { %v115_v16 = vxor.u32 %v113_v13, %v110_v14  ;;  %v116_v17 = vshrl.u32 %v114_v15, 16 }
  0x10   :  { %v117_v18 = vshrl.u32 %v115_v16, 16  ;;  %v118_v19 = vxor.u32 %v116_v17, %v114_v15 }
  0x12   :  { %v119_v20 = vxor.u32 %v117_v18, %v115_v16  ;;  %v120_v21 = vmul.u32 2146121005, %v118_v19 }
  0x14   :  { %v121_v22 = vmul.u32 2146121005, %v119_v20  ;;  %v122_v23 = vshrl.u32 %v120_v21, 15 }
  0x16   :  { %v123_v24 = vshrl.u32 %v121_v22, 15  ;;  %v124_v25 = vxor.u32 %v122_v23, %v120_v21 }
  0x18   :  { %v125_v26 = vxor.u32 %v123_v24, %v121_v22  ;;  %v126_v27 = vmul.u32 2221713035, %v124_v25 }
  0x1a   :  { %v127_v28 = vmul.u32 2221713035, %v125_v26  ;;  %v128_v29 = vshrl.u32 %v126_v27, 16 }
  0x1c   :  { %v129_v30 = vshrl.u32 %v127_v28, 16  ;;  %v130_v31 = vxor.u32 %v128_v29, %v126_v27 }
  0x1e   :  { %v131_v32 = vxor.u32 %v129_v30, %v127_v28  ;;  %v132_v33 = vadd.s32 2654435769, %v130_v31 }
  0x20   :  { %v133_v34 = vadd.s32 2654435769, %v131_v32  ;;  %v134_v35 = vshrl.u32 %v132_v33, 16  ;;  %v378_v32 = vld [vmem:[%s565_s4] sm:$0xff]  }
  0x21   :  { %359 = vmatpush3.bf16.msra.mxu1 %v378_v32 }
  0x22   :  { %v135_v36 = vshrl.u32 %v133_v34, 16  ;;  %v136_v37 = vxor.u32 %v134_v35, %v132_v33  ;;  %360 = vmatprep.subr.bf16.mxu1 %v438_v1 }
  0x24   :  { %v137_v38 = vxor.u32 %v135_v36, %v133_v34  ;;  %v138_v39 = vmul.u32 2146121005, %v136_v37 }
  0x26   :  { %v139_v40 = vmul.u32 2146121005, %v137_v38  ;;  %v140_v41 = vshrl.u32 %v138_v39, 15 }
  0x28   :  { %v141_v42 = vshrl.u32 %v139_v40, 15  ;;  %v142_v43 = vxor.u32 %v140_v41, %v138_v39  ;;  %v379_v41 = vld [vmem:[%s565_s4 + $0x8] sm:$0xff]  }
  0x29   :  { %361 = vmatpush3.bf16.msra.mxu1 %v379_v41 }
  0x2a   :  { %v143_v44 = vxor.u32 %v141_v42, %v139_v40  ;;  %v144_v45 = vmul.u32 2221713035, %v142_v43  ;;  %362 = vmatprep.subr.bf16.mxu1 %v438_v1  ;;  %v380_v42 = vld [vmem:[%s565_s4 + $0x10] sm:$0xff]   ;;  %v381_v43 = vld [vmem:[%s565_s4 + $0x18] sm:$0xff]   ;;  %s440_s4 = smov [#allocation6]  }
  0x2b   :  { %s316_s14 = sshll.u32 %s440_s4, 4  ;;  %s317_s14 = int_to_ptr.vmem [resolvable:$true] %s316_s14 }
  0x2c   :  { %v145_v46 = vmul.u32 2221713035, %v143_v44  ;;  %v146_v47 = vshrl.u32 %v144_v45, 16  ;;  %s390_s15 = scalar_lea.vmem %s317_s14, 256  ;;  %p395_p1 = scmp.lt.s32.totalorder %s317_s14, %s317_s14 }
  0x2d   :  { %363 = vmatpush3.bf16.msra.mxu1 %v380_v42  ;;  %p391_p0 = scmp.ne.s32.totalorder %s317_s14, %s390_s15  ;;  %p396_p2 = scmp.lt.s32.totalorder %s390_s15, %s390_s15 }
  0x2e   :  { %v147_v48 = vshrl.u32 %v145_v46, 16  ;;  %v148_v49 = vxor.u32 %v146_v47, %v144_v45  ;;  %364 = vmatprep.subr.bf16.mxu1 %v438_v1 }
  0x2f   :  { %p397_p3 = por %p396_p2, %p395_p1 }
  0x30   :  { %v149_v50 = vxor.u32 %v147_v48, %v145_v46  ;;  %v150_v51 = vshrl.u32 %v148_v49, 8 }
  0x31   :  { %365 = vmatpush3.bf16.msra.mxu1 %v381_v43  ;;  %p398_p4 = pnand %p397_p3, %p391_p0 }
  0x32   :  { %v151_v52 = vshrl.u32 %v149_v50, 8  ;;  %v152_v53 = vcvt.s32.f32 %v150_v51 }
  0x34   :  { %v153_v54 = vcvt.s32.f32 %v151_v52  ;;  %v154_v55 = vmul.f32 5.9604645e-08, %v152_v53 }
  0x36   :  { %v155_v56 = vmul.f32 5.9604645e-08, %v153_v54  ;;  %v156_v57 = vadd.f32 1e-10, %v154_v55 }
  0x38   :  { %v157_v58 = vadd.f32 1e-10, %v155_v56  ;;  %382 = vlog2.f32 %v156_v57 }
  0x3a   :  { %384 = vlog2.f32 %v157_v58 }
  0x42   :  { %v383_v59 = vpop.eup %382 }
  0x43   :  { %v159_v61 = vmul.f32 0.6931472, %v383_v59 }
  0x44   :  { %v385_v60 = vpop.eup %384 }
  0x45   :  { %v161_v62 = vmul.f32 0.6931472, %v385_v60  ;;  %v162_v63 = vsub.f32 0.0, %v159_v61 }
  0x47   :  { %v163_v0 = vsub.f32 0.0, %v161_v62  ;;  %v164_v2 = vadd.f32 1e-10, %v162_v63 }
  0x49   :  { %v165_v3 = vadd.f32 1e-10, %v163_v0  ;;  %386 = vlog2.f32 %v164_v2 }
  0x4b   :  { %388 = vlog2.f32 %v165_v3 }
  0x53   :  { %v387_v4 = vpop.eup %386 }
  0x54   :  { %v167_v6 = vmul.f32 0.6931472, %v387_v4 }
  0x55   :  { %v389_v5 = vpop.eup %388 }
  0x56   :  { %v169_v7 = vmul.f32 0.6931472, %v389_v5  ;;  %v170_v10 = vsub.f32 0.0, %v167_v6 }
  0x58   :  { %v171_v14 = vsub.f32 0.0, %v169_v7 }
  0xdc   :  { %v88_v11 = vpop.f32.mrb[0].mxu0 }
  0xdd   :  { %v89_v12 = vadd.f32 %v331_v8, %v88_v11  ;;  %v356_v13 = vpop.f32.mrb[1].mxu0 }
  0xde   :  { %v91_v15 = vpop.f32.mrb[2].mxu0 }
  0xdf   :  { %96 = vst.msk [vmem:[#allocation6] sm:$0xff] %vm95_vm2, %v89_v12  ;;  %v92_v16 = vadd.f32 %v331_v8, %v91_v15  ;;  %v357_v17 = vpop.f32.mrb[3].mxu0  ;;  %v172_v18 = vadd.f32 %v170_v10, %v89_v12 }
  0xe1   :  { %97 = vst.msk [vmem:[#allocation6 + $0x8] sm:$0xff] %vm95_vm2, %v92_v16  ;;  %v174_v19 = vsel %vm95_vm2, %v172_v18, -inf  ;;  %v173_v20 = vadd.f32 %v171_v14, %v92_v16 }
  0xe2   :  { %175 = vmax.xlane.f32.xlu0 %v174_v19 }
  0xe3   :  { %v177_v21 = vsel %vm95_vm2, %v173_v20, -inf }
  0xe6   :  { %178 = vmax.xlane.f32.xlu0 %v177_v21 }
 0x16f   :  { %v176_v22 = vpop.xlane.xlu0 %175 }
 0x170   :  { %vm180_vm3 = vcmp.ge.f32.partialorder %v172_v18, %v176_v22 }
 0x171   :  { %v182_v23 = vsel %vm180_vm3, %v497_v9, 64 }
 0x172   :  { %v184_v24 = vsel %vm95_vm2, %v182_v23, 2147483647 }
 0x173   :  { %v179_v25 = vpop.xlane.xlu0 %178  ;;  %v186_v26 = vshra.s32 %v184_v24, 16  ;;  %v185_v33 = vand.u32 65535, %v184_v24 }
 0x174   :  { %vm181_vm4 = vcmp.ge.f32.partialorder %v173_v20, %v179_v25 }
 0x175   :  { %v183_v27 = vsel %vm181_vm4, %v497_v9, 64  ;;  %v188_v28 = vcvt.s32.f32 %v186_v26  ;;  %v187_v35 = vcvt.s32.f32 %v185_v33 }
 0x176   :  { %v199_v29 = vsel %vm95_vm2, %v183_v27, 2147483647 }
 0x177   :  { %189 = vmin.xlane.f32.xlu1 %v188_v28  ;;  %v201_v30 = vshra.s32 %v199_v29, 16  ;;  %v200_v36 = vand.u32 65535, %v199_v29 }
 0x179   :  { %v203_v31 = vcvt.s32.f32 %v201_v30  ;;  %v202_v39 = vcvt.s32.f32 %v200_v36 }
 0x17b   :  { %204 = vmin.xlane.f32.xlu1 %v203_v31 }
 0x204   :  { %v190_v34 = vpop.xlane.xlu1 %189 }
 0x205   :  { %vm191_vm5 = vcmp.eq.f32.partialorder %v188_v28, %v190_v34  ;;  %v196_v44 = vcvt.f32.s32 %v190_v34 }
 0x206   :  { %v192_v37 = vsel %vm191_vm5, %v187_v35, inf }
 0x207   :  { %193 = vmin.xlane.f32.xlu0 %v192_v37  ;;  %v197_v46 = vshll.u32 %v196_v44, 16 }
 0x208   :  { %v205_v38 = vpop.xlane.xlu1 %204 }
 0x209   :  { %vm206_vm6 = vcmp.eq.f32.partialorder %v203_v31, %v205_v38  ;;  %v211_v47 = vcvt.f32.s32 %v205_v38 }
 0x20a   :  { %v207_v40 = vsel %vm206_vm6, %v202_v39, inf }
 0x20b   :  { %208 = vmin.xlane.f32.xlu1 %v207_v40  ;;  %v212_v51 = vshll.u32 %v211_v47, 16 }
 0x294   :  { %v194_v45 = vpop.xlane.xlu0 %193 }
 0x295   :  { %v195_v48 = vcvt.f32.s32 %v194_v45 }
 0x297   :  { %v198_v49 = vadd.s32 %v197_v46, %v195_v48 }
 0x298   :  { %v209_v50 = vpop.xlane.xlu1 %208 }
 0x299   :  { %v210_v52 = vcvt.f32.s32 %v209_v50  ;;  %vm214_vm7 = vcmp.eq.s32.totalorder %v497_v9, %v198_v49 }
 0x29a   :  { %v335_v54 = vsel %vm214_vm7, 1.0, %v438_v1 }
 0x29b   :  { %v213_v53 = vadd.s32 %v212_v51, %v210_v52 }
 0x29d   :  { %vm215_vm8 = vcmp.eq.s32.totalorder %v497_v9, %v213_v53 }
 0x29e   :  { %v336_v55 = vsel %vm215_vm8, 1.0, %v438_v1 }
 0x29f   :  { %v220_v56 = vpack.c.bf16 %v336_v55, %v335_v54 }
 0x2a1   :  { %367 = vmatmul.mubr.msk.bf16.vlgmr.msra.gmra.mrb[0].mxu1 %vm95_vm2, %v220_v56 }
 0x2a2   :  { %401 = shalt.err (!%p398_p4)
}
 0x2a3   :  { %s402_s18 = scalar_lea.hbm %s567_s6, 256 }
 0x2a4   :  { %p403_p5 = scmp.ne.s32.totalorder %s567_s6, %s402_s18  ;;  %p406_p6 = scmp.lt.u32.totalorder %s402_s18, %s567_s6 }
 0x2a6   :  { %p408_p7 = pnand %p406_p6, %p403_p5 }
 0x2a8   :  { %411 = shalt.err (!%p408_p7)
}
 0x2a9   :  { %s441_s23 = smov 128   ;;  %s442_s24 = smov 8  }
 0x2aa   :  { %322 = dma.vmem_to_hbm [thread:$0]  %s317_s14, 256, %s567_s6, [#allocation7], %s441_s23, %s441_s23, %s442_s24  }
 0x2ab   :  { %s443_s27 = smov [#allocation4]  }
 0x2ac   :  { %s304_s28 = sshll.u32 %s443_s27, 4  ;;  %s305_s28 = int_to_ptr.vmem [resolvable:$true] %s304_s28 }
 0x2ad   :  { %s412_s2 = scalar_lea.vmem %s305_s28, 256  ;;  %p417_p9 = scmp.lt.s32.totalorder %s305_s28, %s305_s28 }
 0x2ae   :  { %p413_p8 = scmp.ne.s32.totalorder %s305_s28, %s412_s2  ;;  %p418_p10 = scmp.lt.s32.totalorder %s412_s2, %s412_s2 }
 0x2b0   :  { %p419_p11 = por %p418_p10, %p417_p9 }
 0x2b2   :  { %p420_p12 = pnand %p419_p11, %p413_p8 }
 0x374   :  { %v290_v1 = vpop.f32.mrb[0].mxu1 }
 0x375   :  { %297 = vst.msk [vmem:[#allocation4] sm:$0xff] %vm50_vm1, %v290_v1  ;;  %v368_v9 = vpop.f32.mrb[1].mxu1 }
 0x376   :  { %v293_v57 = vpop.f32.mrb[2].mxu1 }
 0x377   :  { %298 = vst.msk [vmem:[#allocation4 + $0x8] sm:$0xff] %vm50_vm1, %v293_v57  ;;  %v369_v58 = vpop.f32.mrb[3].mxu1 }
 0x378   :  { %423 = shalt.err (!%p420_p12)
}
 0x379   :  { %s424_s1 = scalar_lea.hbm %s566_s5, 256 }
 0x37a   :  { %p425_p13 = scmp.ne.s32.totalorder %s566_s5, %s424_s1  ;;  %p428_p0 = scmp.lt.u32.totalorder %s424_s1, %s566_s5 }
 0x37c   :  { %p430_p1 = pnand %p428_p0, %p425_p13 }
 0x37e   :  { %433 = shalt.err (!%p430_p1)
}
 0x37f   :  { %310 = dma.vmem_to_hbm [thread:$0]  %s305_s28, 256, %s566_s5, [#allocation5], %s441_s23, %s441_s23, %s442_s24  }
 0x380   :  { %434 = dma.done.wait [#allocation5], 256  }
 0x381   :  { %435 = vsyncadd [#allocation5], 4294967040 }
 0x382   :  { %436 = dma.done.wait [#allocation7], 256  }
 0x383   :  { %437 = vsyncadd [#allocation7], 4294967040 }
 0x384   :  { %329 = vsyncpa [#allocation5], 1 }
 0x385   :  { %330 = vsyncpa [#allocation7], 1 }

</bundles_post_ra>
